<compile_context>
chip_gen: v7x
topology: tpu7x:2x2x1
jax: 0.10.0
libtpu: 0.0.40
codegen_flags: <defaults>
</compile_context>

<pallas_src>
import jax
import jax.numpy as jnp
from jax.experimental import pallas as pl
from jax.experimental.pallas import tpu as pltpu


def _se_kernel(x_ref, w1t_ref, w2_ref, o_ref):
    # x_ref block: (1, C, H*W)   — channels on sublanes, spatial on lanes.
    # w1t_ref    : (C, hidden)   — fc1 weight transposed (torch fc1.weight is (hidden, C)).
    # w2_ref     : (C, hidden)   — fc2 weight as-is      (torch fc2.weight is (C, hidden)).
    x = x_ref[0]                                             # (C, HW) f32
    inv_hw = jnp.float32(1.0 / x.shape[1])

    # --- squeeze: global average pool over spatial (cross-lane reduce, XLU) ---
    pooled = jnp.sum(x, axis=1, keepdims=True) * inv_hw      # (C, 1)

    # --- excitation, fc1 (no bias) + ReLU ---
    # y1[h] = sum_c W1[h, c] * pooled[c]  ==  sublane-reduce of (C, hidden) * (C, 1)
    y1 = jnp.sum(w1t_ref[...] * pooled, axis=0, keepdims=True)   # (1, hidden)
    y1 = jnp.maximum(y1, 0.0)

    # --- excitation, fc2 (no bias) + sigmoid ---
    # s[c] = sum_h W2[c, h] * y1[h]  ==  lane-reduce of (C, hidden) * (1, hidden)
    s = jnp.sum(w2_ref[...] * y1, axis=1, keepdims=True)         # (C, 1)
    scale = 1.0 / (1.0 + jnp.exp(-s))                            # sigmoid (EUP exp/recip)

    # --- channel-wise rescale (lane-broadcast multiply, full-width stores) ---
    o_ref[0] = (x * scale).astype(o_ref.dtype)


def squeeze_excite_block(x, fc1_weight, fc2_weight):
    """x: (B, C, H, W).  fc1_weight: (C//r, C).  fc2_weight: (C, C//r).  Returns NCHW."""
    B, C, H, W = x.shape
    hw = H * W
    hidden = fc1_weight.shape[0]
    assert fc1_weight.shape == (hidden, C)
    assert fc2_weight.shape == (C, hidden)

    x_rows = x.reshape(B, C, hw)                 # free reshape, no transpose
    w1t = jnp.transpose(fc1_weight).astype(jnp.float32)   # (C, hidden)
    w2 = fc2_weight.astype(jnp.float32)                   # (C, hidden)

    out_rows = pl.pallas_call(
        _se_kernel,
        out_shape=jax.ShapeDtypeStruct((B, C, hw), x.dtype),
        grid_spec=pltpu.PrefetchScalarGridSpec(
            num_scalar_prefetch=0,
            grid=(B,),
            in_specs=[
                pl.BlockSpec((1, C, hw), lambda b: (b, 0, 0)),
                pl.BlockSpec((C, hidden), lambda b: (0, 0)),
                pl.BlockSpec((C, hidden), lambda b: (0, 0)),
            ],
            out_specs=pl.BlockSpec((1, C, hw), lambda b: (b, 0, 0)),
        ),
        compiler_params=pltpu.CompilerParams(dimension_semantics=("parallel",)),
    )(x_rows, w1t, w2)

    return out_rows.reshape(B, C, H, W)          # free reshape back to NCHW


def _reference(x, fc1_weight, fc2_weight):
    """Pure-JAX transcription of the PyTorch SqueezeExciteBlock.forward (NCHW)."""
    y = jnp.mean(x, axis=(2, 3))                               # AdaptiveAvgPool2d(1)
    y = jnp.maximum(y @ fc1_weight.T, 0.0)                     # Linear(C, C//r) + ReLU
    y = jax.nn.sigmoid(y @ fc2_weight.T)                       # Linear(C//r, C) + Sigmoid
    return x * y[:, :, None, None]


if __name__ == "__main__":
    key = jax.random.PRNGKey(0)
    k = jax.random.split(key, 3)

    B, C, H, W = 2, 64, 16, 16
    r = 16
    hidden = C // r                                            # 4

    x = jax.random.normal(k[0], (B, C, H, W), jnp.float32)
    fc1_w = 0.2 * jax.random.normal(k[1], (hidden, C), jnp.float32)   # Linear(C, C//r).weight
    fc2_w = 0.2 * jax.random.normal(k[2], (C, hidden), jnp.float32)   # Linear(C//r, C).weight

    out = squeeze_excite_block(x, fc1_w, fc2_w)
    out = jax.block_until_ready(out)

    ref = _reference(x, fc1_w, fc2_w)
    assert out.shape == (B, C, H, W), out.shape
    assert jnp.allclose(out, ref, atol=1e-5, rtol=1e-5), \
        float(jnp.max(jnp.abs(out - ref)))
    print("KERNEL_OK")
</pallas_src>

<mosaic_0001>
module attributes {stable_mosaic.version = 11 : i64} {
  func.func @_se_kernel(%arg0: i32, %arg1: memref<1x64x256xf32, #tpu.memory_space<vmem>>, %arg2: memref<64x4xf32, #tpu.memory_space<vmem>>, %arg3: memref<64x4xf32, #tpu.memory_space<vmem>>, %arg4: memref<1x64x256xf32, #tpu.memory_space<vmem>>) attributes {dimension_semantics = [#tpu.dimension_semantics<parallel>], iteration_bounds = array<i64: 2>, scalar_prefetch = 0 : i64, scratch_operands = 0 : i64, tpu.core_type = #tpu.core_type<tc>, window_params = [{transform_indices = @transform_0, window_bounds = array<i64: 1, 64, 256>}, {pipeline_mode = #tpu.pipeline_mode<synchronous>, transform_indices = @transform_1, window_bounds = array<i64: 64, 4>}, {pipeline_mode = #tpu.pipeline_mode<synchronous>, transform_indices = @transform_2, window_bounds = array<i64: 64, 4>}, {transform_indices = @transform_3, window_bounds = array<i64: 1, 64, 256>}]} {
    %c0 = arith.constant 0 : index
    %c0_0 = arith.constant 0 : index
    %c0_1 = arith.constant 0 : index
    %0 = vector.load %arg1[%c0, %c0_0, %c0_1] : memref<1x64x256xf32, #tpu.memory_space<vmem>>, vector<1x64x256xf32>
    %1 = vector.shape_cast %0 : vector<1x64x256xf32> to vector<64x256xf32>
    %cst = arith.constant dense<0.000000e+00> : vector<64xf32>
    %2 = vector.multi_reduction <add>, %1, %cst [1] : vector<64x256xf32> to vector<64xf32>
    %3 = vector.shape_cast %2 : vector<64xf32> to vector<64x1xf32>
    %cst_2 = arith.constant 3.906250e-03 : f32
    %4 = vector.broadcast %cst_2 : f32 to vector<64x1xf32>
    %5 = arith.mulf %3, %4 : vector<64x1xf32>
    %c0_3 = arith.constant 0 : index
    %c0_4 = arith.constant 0 : index
    %6 = vector.load %arg2[%c0_3, %c0_4] : memref<64x4xf32, #tpu.memory_space<vmem>>, vector<64x4xf32>
    %7 = vector.broadcast %5 : vector<64x1xf32> to vector<64x4xf32>
    %8 = arith.mulf %6, %7 : vector<64x4xf32>
    %cst_5 = arith.constant dense<0.000000e+00> : vector<4xf32>
    %9 = vector.multi_reduction <add>, %8, %cst_5 [0] : vector<64x4xf32> to vector<4xf32>
    %10 = vector.shape_cast %9 : vector<4xf32> to vector<1x4xf32>
    %cst_6 = arith.constant 0.000000e+00 : f32
    %11 = vector.broadcast %cst_6 : f32 to vector<1x4xf32>
    %12 = arith.maximumf %10, %11 : vector<1x4xf32>
    %c0_7 = arith.constant 0 : index
    %c0_8 = arith.constant 0 : index
    %13 = vector.load %arg3[%c0_7, %c0_8] : memref<64x4xf32, #tpu.memory_space<vmem>>, vector<64x4xf32>
    %14 = vector.broadcast %12 : vector<1x4xf32> to vector<64x4xf32>
    %15 = arith.mulf %13, %14 : vector<64x4xf32>
    %cst_9 = arith.constant dense<0.000000e+00> : vector<64xf32>
    %16 = vector.multi_reduction <add>, %15, %cst_9 [1] : vector<64x4xf32> to vector<64xf32>
    %17 = vector.shape_cast %16 : vector<64xf32> to vector<64x1xf32>
    %cst_10 = arith.constant 0.000000e+00 : f32
    %18 = vector.broadcast %cst_10 : f32 to vector<64x1xf32>
    %19 = arith.subf %18, %17 : vector<64x1xf32>
    %20 = math.exp %19 : vector<64x1xf32>
    %cst_11 = arith.constant 1.000000e+00 : f32
    %21 = vector.broadcast %cst_11 : f32 to vector<64x1xf32>
    %22 = arith.addf %21, %20 : vector<64x1xf32>
    %cst_12 = arith.constant 1.000000e+00 : f32
    %23 = vector.broadcast %cst_12 : f32 to vector<64x1xf32>
    %24 = arith.divf %23, %22 : vector<64x1xf32>
    %25 = vector.broadcast %24 : vector<64x1xf32> to vector<64x256xf32>
    %26 = arith.mulf %1, %25 : vector<64x256xf32>
    %c0_13 = arith.constant 0 : index
    %c0_14 = arith.constant 0 : index
    %c0_15 = arith.constant 0 : index
    %27 = vector.load %arg4[%c0_13, %c0_14, %c0_15] : memref<1x64x256xf32, #tpu.memory_space<vmem>>, vector<1x64x256xf32>
    %28 = vector.shape_cast %27 : vector<1x64x256xf32> to vector<64x256xf32>
    %29 = vector.shape_cast %26 : vector<64x256xf32> to vector<1x64x256xf32>
    tpu.vector_store %arg4[%c0_13, %c0_14, %c0_15], %29 {strides = array<i32>} : memref<1x64x256xf32, #tpu.memory_space<vmem>>, vector<1x64x256xf32>,
    return
  }
  func.func @transform_0(%arg0: i32) -> (i32, i32, i32) {
    %c0_i32 = arith.constant 0 : i32
    %c0_i32_0 = arith.constant 0 : i32
    %c0_i32_1 = arith.constant 0 : i32
    return %arg0, %c0_i32, %c0_i32_0 : i32, i32, i32
  }
  func.func @transform_1(%arg0: i32) -> (i32, i32) {
    %c0_i32 = arith.constant 0 : i32
    %c0_i32_0 = arith.constant 0 : i32
    %c0_i32_1 = arith.constant 0 : i32
    return %c0_i32, %c0_i32_0 : i32, i32
  }
  func.func @transform_2(%arg0: i32) -> (i32, i32) {
    %c0_i32 = arith.constant 0 : i32
    %c0_i32_0 = arith.constant 0 : i32
    %c0_i32_1 = arith.constant 0 : i32
    return %c0_i32, %c0_i32_0 : i32, i32
  }
  func.func @transform_3(%arg0: i32) -> (i32, i32, i32) {
    %c0_i32 = arith.constant 0 : i32
    %c0_i32_0 = arith.constant 0 : i32
    %c0_i32_1 = arith.constant 0 : i32
    return %arg0, %c0_i32, %c0_i32_0 : i32, i32, i32
  }
}

</mosaic_0001>

<bundles_post_ra>
// kernel: tpu_custom_call.1
= control target key start
LH: loop header
LB: loop body
LE: loop exit
PB: predicated region body
PF: predicated region fallthrough
CT: control target
= control target key end

     0   :  { %8 = vsyncpa [#allocation3], 0  ;;  %s1018_s0 = inlined_call_operand.hbm [shape: f32[2,64,256], index: 0, kind: input, shape index: {}]   ;;  %s1019_s1 = inlined_call_operand.vmem [shape: f32[64,4], index: 1, kind: input, shape index: {}]   ;;  %s1020_s2 = inlined_call_operand.vmem [shape: f32[64,4], index: 2, kind: input, shape index: {}]   ;;  %s1021_s3 = inlined_call_operand.hbm [shape: f32[2,64,256], index: 3, kind: output, shape index: {}]  }
   0x1   :  { %10 = vsyncpa [#allocation3 + $0x1], 0 }
   0x2   :  { %11 = vsyncpa [#allocation4], 0 }
   0x3   :  { %13 = vsyncpa [#allocation4 + $0x1], 0  ;;  %s705_s12 = smov 0   ;;  %s707_s13 = smov 0  }
   0x4   :  { %s709_s14 = smov 0   ;;  %s711_s15 = smov 0  }
   0x5 LB: > { %s726_s16 = sadd.s32 4294967295, %s677_s15   ;;  %s483_s17 = sadd.s32 4294967294, %s677_s15   ;;  %s677_s15 = sphi %s711_s15, %s1034_s15   ;;  %s673_s14 = sphi %s709_s14, %s1033_s14   ;;  %s669_s13 = sphi %s707_s13, %s1032_s13   ;;  %s665_s12 = sphi %s705_s12, %s1031_s12  }
   0x6   : > { %s730_s18 = sadd.s32 1, %s677_s15   ;;  %s26_s19 = sadd.s32 1, %s673_s14 }
   0x7   : > { %s23_s20 = ssub.s32 %s677_s15, %s730_s18  ;;  %p33_p0 = scmp.ne.s32.totalorder %s673_s14, %s669_s13 }
   0x8   : > { %p24_p1 = scmp.eq.s32.totalorder %s23_s20, 0  ;;  %p34_p2 = scmp.eq.s32.totalorder %s677_s15, 0 }
   0x9   : > { %p39_p3 = scmp.ne.s32.totalorder %s669_s13, %s665_s12  ;;  %p40_p4 = scmp.eq.s32.totalorder %s726_s16, 0 }
   0xa   : > { %s742_s21 = scalar_select %p24_p1, %s673_s14, %s26_s19  }
   0xb   : > { %p744_p5 = por %p34_p2, %p33_p0  ;;  %p748_p6 = por %p40_p4, %p39_p3 }
   0xc   : > { %p105_p7 = scmp.eq.s32.totalorder %s726_s16, 1  ;;  %p111_p8 = scmp.eq.s32.totalorder %s483_s17, 1 }
   0xd   : > { %p511_p10 = scmp.lt.s32.totalorder %s677_s15, 2  ;;  %s137_s26 = sand.u32 1, %s673_s14  }
   0xe   : > { %p755_p11 = por %p105_p7, %p33_p0  ;;  %p759_p12 = por %p111_p8, %p39_p3 }
   0xf   : > { %s497_s27 = sshll.u32 %s677_s15, 11  ;;  %s486_s28 = sshll.u32 %s137_s26, 7 }
  0x10   : > { %s1025_s24 = scalar_select %p755_p11, 1, 0 }
  0x11   : > { %s1026_s25 = scalar_select %p759_p12, 1, 0 }
  0x12   : > { %s768_s4 = scalar_lea.hbm %s1018_s0, %s497_s27  ;;  %s141_s5 = scalar_lea.vmem [#allocation2], %s486_s28 }
  0x13   : > { %s148_s6 = sshll.u32 %s141_s5, 4  ;;  %p772_p13 = pnand %p511_p10, %p744_p5  ;;  %s776_s6 = int_to_ptr.vmem [resolvable:$true] %s148_s6 }
  0x14   : > { %s778_s8 = scalar_lea.sflag [#allocation3], %s137_s26  ;;  %s581_s9 = scalar_lea.hbm %s768_s4, 2048 }
  0x15   : > { %p582_p0 = scmp.ne.s32.totalorder %s768_s4, %s581_s9  ;;  %p583_p1 = pneg %p772_p13 }
  0x16   : > { %s586_s17 = scalar_lea.hbm %s1018_s0, 4096  ;;  %p587_p4 = scmp.lt.u32.totalorder %s768_s4, %s1018_s0 }
  0x17   : > { %p584_p2 = pnand %p583_p1, %p582_p0  ;;  %p588_p5 = scmp.lt.u32.totalorder %s586_s17, %s581_s9 }
  0x18   : > { %p590_p8 = scmp.lt.u32.totalorder %s581_s9, %s768_s4 }
  0x19   : > { %p585_p3 = pneg %p584_p2  ;;  %p589_p7 = por %p588_p5, %p587_p4 }
  0x1b   : > { %p591_p10 = por %p590_p8, %p589_p7 }
  0x1d   : > { %p592_p9 = pnand %p591_p10, %p585_p3 }
  0x1f   : > { %595 = shalt.err (!%p592_p9)
}
  0x20   : > { %s596_s22 = scalar_lea.vmem %s776_s6, 2048  ;;  %s679_s26 = smov [#allocation2]  }
  0x21   : > { %p597_p0 = scmp.ne.s32.totalorder %s776_s6, %s596_s22  ;;  %s601_s27 = sshll.u32 %s679_s26, 4  ;;  %s602_s27 = int_to_ptr.vmem [resolvable:$false] %s601_s27 }
  0x22   : > { %s603_s28 = scalar_lea.vmem %s602_s27, 4096  ;;  %p604_p11 = scmp.lt.s32.totalorder %s776_s6, %s602_s27 }
  0x23   : > { %p599_p2 = pnand %p597_p0, %p583_p1  ;;  %p605_p4 = scmp.lt.s32.totalorder %s603_s28, %s596_s22 }
  0x25   : > { %p600_p12 = pneg %p599_p2  ;;  %p606_p5 = por %p605_p4, %p604_p11 }
  0x27   : > { %p607_p7 = pnand %p606_p5, %p600_p12 }
  0x29   : > { %610 = shalt.err (!%p607_p7)
}
  0x2a   : > { %s680_s29 = smov 256   ;;  %s681_s30 = smov 16  }
  0x2b   : > { %506 = dma.hbm_to_vmem [thread:$0]  (!%p772_p13), %s768_s4, 2048, %s776_s6, %s778_s8, %s680_s29, %s680_s29, %s681_s30  }
  0x2c   : > { %p489_p9 = scmp.ge.s32.totalorder %s677_s15, 1  ;;  %p156_p1 = scmp.lt.s32.totalorder %s677_s15, 3 }
  0x2e   : > { %p157_p3 = pnand %p489_p9, %p156_p1 }
  0x2f   : > { %s809_s5 = sand.u32 (!%p157_p3), 1, %s669_s13  }
  0x30   : > { %160 = sbr.rel (%p157_p3) target bundleno = 443 (0x1bb), region = 32  ;;  %s490_s9 = sshll.u32 (!%p157_p3), %s809_s5, 7 }
  0x31   : > { %s163_s10 = scalar_lea.sflag (!%p157_p3), [#allocation3], %s809_s5  ;;  %s166_s11 = scalar_lea.vmem (!%p157_p3), [#allocation2], %s490_s9 }
  0x37   : > { %656 = dma.done.wait (%p748_p6), %s163_s10, 2048  }
  0x38   : > { %658 = vsyncadd (%p748_p6), %s163_s10, 4294965248  ;;  %v819_v0 = vld [vmem:[%s166_s11] sm:$0xff]  ;;  %v821_v1 = vld [vmem:[%s166_s11 + $0x8] sm:$0xff]  ;;  %vm253_vm0 = vcmask 31744   ;;  %s937_s23 = scalar_lea.vmem [#allocation5], %s490_s9  ;;  %s498_s9 = sshll.u32 %s726_s16, 11 }
  0x39   : > { %v823_v2 = vld [vmem:[%s166_s11 + $0x20] sm:$0xff]  ;;  %v205_v3 = vadd.f32 %v821_v1, %v819_v0  ;;  %v827_v4 = vld [vmem:[%s166_s11 + $0x28] sm:$0xff]  ;;  %v829_v5 = vld [vmem:[%s166_s11 + $0x10] sm:$0xff]  ;;  %s410_s4 = sshll.u32 %s937_s23, 4  ;;  %s968_s8 = scalar_lea.hbm %s1021_s3, %s498_s9  ;;  %s970_s4 = int_to_ptr.vmem [resolvable:$true] %s410_s4 }
  0x3a   : > { %v831_v6 = vld [vmem:[%s166_s11 + $0x18] sm:$0xff]  ;;  %v211_v7 = vadd.f32 %v827_v4, %v823_v2  ;;  %v835_v8 = vld [vmem:[%s166_s11 + $0x30] sm:$0xff]  ;;  %v843_v12 = vld [vmem:[%s166_s11 + $0x40] sm:$0xff]  ;;  %s397_s16 = scalar_lea.sflag [#allocation4], %s809_s5  ;;  %s611_s17 = scalar_lea.vmem %s970_s4, 2048 }
  0x3b   : > { %v837_v9 = vld [vmem:[%s166_s11 + $0x38] sm:$0xff]  ;;  %206 = vadd.xlane.f32.xlu0 %v205_v3  ;;  %v208_v10 = vadd.f32 %v831_v6, %v829_v5  ;;  %v845_v13 = vld [vmem:[%s166_s11 + $0x48] sm:$0xff]  ;;  %v847_v14 = vld [vmem:[%s166_s11 + $0x50] sm:$0xff]  ;;  %p612_p6 = scmp.ne.s32.totalorder %s970_s4, %s611_s17  ;;  %p1028_p11 = scmp.ne.s32.totalorder %s1025_s24, 0 }
  0x3c   : > { %212 = vadd.xlane.f32.xlu1 %v211_v7  ;;  %v214_v11 = vadd.f32 %v837_v9, %v835_v8  ;;  %v849_v15 = vld [vmem:[%s166_s11 + $0x58] sm:$0xff]  ;;  %v217_v16 = vadd.f32 %v845_v13, %v843_v12  ;;  %v855_v18 = vld [vmem:[%s166_s11 + $0x60] sm:$0xff]  ;;  %v857_v19 = vld [vmem:[%s166_s11 + $0x68] sm:$0xff]  ;;  %s682_s19 = smov [#allocation5]  }
  0x3d   : > { %v220_v17 = vadd.f32 %v849_v15, %v847_v14  ;;  %v859_v20 = vld [vmem:[%s166_s11 + $0x70] sm:$0xff]  ;;  %v861_v21 = vld [vmem:[%s166_s11 + $0x78] sm:$0xff]  ;;  %v223_v22 = vadd.f32 %v857_v19, %v855_v18  ;;  %v237_v27 = vld [vmem:[%s1019_s1] sm:$0xff]  ;;  %p613_p12 = pnand %p612_p6, %p1028_p11  ;;  %s615_s20 = sshll.u32 %s682_s19, 4  ;;  %s616_s20 = int_to_ptr.vmem [resolvable:$false] %s615_s20 }
  0x3e   : > { %v226_v23 = vadd.f32 %v861_v21, %v859_v20  ;;  %v239_v29 = vld [vmem:[%s1019_s1 + $0x10] sm:$0xff]  ;;  %v238_v30 = vld [vmem:[%s1019_s1 + $0x8] sm:$0xff]  ;;  %v240_v34 = vld [vmem:[%s1019_s1 + $0x18] sm:$0xff]  ;;  %s617_s22 = scalar_lea.vmem %s616_s20, 4096  ;;  %p618_p8 = scmp.lt.s32.totalorder %s970_s4, %s616_s20 }
  0x3f   : > { %209 = vadd.xlane.f32.xlu0 %v208_v10  ;;  %v241_v40 = vld [vmem:[%s1019_s1 + $0x20] sm:$0xff]  ;;  %v242_v45 = vld [vmem:[%s1019_s1 + $0x28] sm:$0xff]  ;;  %v243_v54 = vld [vmem:[%s1019_s1 + $0x30] sm:$0xff]  ;;  %p614_p13 = pneg %p613_p12  ;;  %p619_p10 = scmp.lt.s32.totalorder %s617_s22, %s611_s17 }
  0x40   : > { %215 = vadd.xlane.f32.xlu1 %v214_v11  ;;  %v244_v58 = vld [vmem:[%s1019_s1 + $0x38] sm:$0xff] }
  0x41   : > { %p620_p0 = por %p619_p10, %p618_p8 }
  0x43   : > { %218 = vadd.xlane.f32.xlu0 %v217_v16  ;;  %p621_p2 = pnand %p620_p0, %p614_p13 }
  0x44   : > { %221 = vadd.xlane.f32.xlu1 %v220_v17 }
  0x47   : > { %224 = vadd.xlane.f32.xlu0 %v223_v22 }
  0x48   : > { %227 = vadd.xlane.f32.xlu1 %v226_v23 }
  0xc8   : > { %v207_v24 = vpop.xlane.xlu0 %206 }
  0xc9   : > { %v229_v25 = vmul.f32 0.00390625, %v207_v24  ;;  %v213_v26 = vpop.xlane.xlu1 %212 }
  0xca   : > { %v231_v28 = vmul.f32 0.00390625, %v213_v26 }
  0xcb   : > { %v245_v32 = vmul.f32 %v237_v27, %v229_v25 }
  0xcc   : > { %v210_v31 = vpop.xlane.xlu0 %209  ;;  %v247_v37 = vmul.f32 %v239_v29, %v231_v28  ;;  %v277_v29 = vld [vmem:[%s1020_s2 + $0x8] sm:$0xff] }
  0xcd   : > { %v230_v33 = vmul.f32 0.00390625, %v210_v31  ;;  %v216_v35 = vpop.xlane.xlu1 %215  ;;  %v254_v42 = vsel %vm253_vm0, %v245_v32, 0.0  ;;  %v279_v32 = vld [vmem:[%s1020_s2 + $0x18] sm:$0xff] }
  0xce   : > { %v232_v36 = vmul.f32 0.00390625, %v216_v35  ;;  %v257_v49 = vsel %vm253_vm0, %v247_v37, 0.0 }
  0xcf   : > { %v246_v38 = vmul.f32 %v238_v30, %v230_v33  ;;  %v276_v30 = vld [vmem:[%s1020_s2] sm:$0xff]  ;;  %v278_v33 = vld [vmem:[%s1020_s2 + $0x10] sm:$0xff] }
  0xd0   : > { %v248_v39 = vmul.f32 %v240_v34, %v232_v36  ;;  %v219_v41 = vpop.xlane.xlu0 %218 }
  0xd1   : > { %v255_v43 = vsel %vm253_vm0, %v246_v38, 0.0  ;;  %v233_v44 = vmul.f32 0.00390625, %v219_v41  ;;  %v222_v46 = vpop.xlane.xlu1 %221  ;;  %v280_v41 = vld [vmem:[%s1020_s2 + $0x20] sm:$0xff] }
  0xd2   : > { %v256_v47 = vadd.f32 %v255_v43, %v254_v42  ;;  %v234_v48 = vmul.f32 0.00390625, %v222_v46  ;;  %v259_v50 = vsel %vm253_vm0, %v248_v39, 0.0  ;;  %v283_v46 = vld [vmem:[%s1020_s2 + $0x38] sm:$0xff] }
  0xd3   : > { %v249_v51 = vmul.f32 %v241_v40, %v233_v44  ;;  %v281_v40 = vld [vmem:[%s1020_s2 + $0x28] sm:$0xff] }
  0xd4   : > { %v258_v52 = vadd.f32 %v257_v49, %v256_v47  ;;  %v250_v53 = vmul.f32 %v242_v45, %v234_v48  ;;  %v225_v55 = vpop.xlane.xlu0 %224  ;;  %v282_v47 = vld [vmem:[%s1020_s2 + $0x30] sm:$0xff] }
  0xd5   : > { %v261_v56 = vsel %vm253_vm0, %v249_v51, 0.0  ;;  %v235_v57 = vmul.f32 0.00390625, %v225_v55  ;;  %v228_v59 = vpop.xlane.xlu1 %227 }
  0xd6   : > { %v260_v60 = vadd.f32 %v259_v50, %v258_v52  ;;  %v236_v61 = vmul.f32 0.00390625, %v228_v59  ;;  %v263_v62 = vsel %vm253_vm0, %v250_v53, 0.0 }
  0xd7   : > { %v251_v63 = vmul.f32 %v243_v54, %v235_v57 }
  0xd8   : > { %v262_v3 = vadd.f32 %v261_v56, %v260_v60  ;;  %v252_v7 = vmul.f32 %v244_v58, %v236_v61 }
  0xd9   : > { %v265_v10 = vsel %vm253_vm0, %v251_v63, 0.0 }
  0xda   : > { %v264_v11 = vadd.f32 %v263_v62, %v262_v3  ;;  %v267_v16 = vsel %vm253_vm0, %v252_v7, 0.0 }
  0xdc   : > { %v266_v17 = vadd.f32 %v265_v10, %v264_v11 }
  0xde   : > { %v268_v22 = vadd.f32 %v267_v16, %v266_v17 }
  0xe0   : > { %v269_v23 = vrot.slane %v268_v22, 4 }
  0xe2   : > { %v270_v24 = vadd.f32 %v269_v23, %v268_v22 }
  0xe4   : > { %v271_v25 = vrot.slane %v270_v24, 2 }
  0xe6   : > { %v272_v26 = vadd.f32 %v271_v25, %v270_v24 }
  0xe8   : > { %v273_v27 = vrot.slane %v272_v26, 1 }
  0xea   : > { %v274_v28 = vadd.f32 %v273_v27, %v272_v26 }
  0xec   : > { %v275_v31 = vmax.f32 %v274_v28, 0.0 }
  0xee   : > { %v285_v34 = vmul.f32 %v277_v29, %v275_v31  ;;  %v284_v35 = vmul.f32 %v276_v30, %v275_v31  ;;  %v287_v38 = vmul.f32 %v279_v32, %v275_v31  ;;  %v286_v39 = vmul.f32 %v278_v33, %v275_v31 }
  0xef   : > { %v289_v44 = vmul.f32 %v281_v40, %v275_v31  ;;  %v288_v45 = vmul.f32 %v280_v41, %v275_v31  ;;  %v291_v50 = vmul.f32 %v283_v46, %v275_v31  ;;  %v290_v51 = vmul.f32 %v282_v47, %v275_v31 }
  0xf0   : > { %v295_v36 = vsel %vm253_vm0, %v285_v34, 0.0  ;;  %v292_v37 = vsel %vm253_vm0, %v284_v35, 0.0  ;;  %v301_v42 = vsel %vm253_vm0, %v287_v38, 0.0  ;;  %v298_v43 = vsel %vm253_vm0, %v286_v39, 0.0 }
  0xf1   : > { %296 = vadd.xlane.f32.xlu1 %v295_v36  ;;  %293 = vadd.xlane.f32.xlu0 %v292_v37  ;;  %v307_v48 = vsel %vm253_vm0, %v289_v44, 0.0  ;;  %v304_v49 = vsel %vm253_vm0, %v288_v45, 0.0  ;;  %v313_v52 = vsel %vm253_vm0, %v291_v50, 0.0  ;;  %v310_v53 = vsel %vm253_vm0, %v290_v51, 0.0 }
  0xf5   : > { %302 = vadd.xlane.f32.xlu1 %v301_v42  ;;  %299 = vadd.xlane.f32.xlu0 %v298_v43 }
  0xf9   : > { %308 = vadd.xlane.f32.xlu1 %v307_v48  ;;  %305 = vadd.xlane.f32.xlu0 %v304_v49 }
  0xfd   : > { %314 = vadd.xlane.f32.xlu1 %v313_v52  ;;  %311 = vadd.xlane.f32.xlu0 %v310_v53 }
 0x17e   : > { %v297_v54 = vpop.xlane.xlu1 %296  ;;  %v294_v55 = vpop.xlane.xlu0 %293 }
 0x17f   : > { %v317_v56 = vsub.f32 0.0, %v297_v54  ;;  %v316_v57 = vsub.f32 0.0, %v294_v55 }
 0x181   : > { %v326_v58 = vmul.f32 1.442695, %v317_v56  ;;  %v324_v59 = vmul.f32 1.442695, %v316_v57 }
 0x182   : > { %v303_v60 = vpop.xlane.xlu1 %302  ;;  %v300_v61 = vpop.xlane.xlu0 %299 }
 0x183   : > { %549 = vpow2.f32 %v326_v58  ;;  %v319_v62 = vsub.f32 0.0, %v303_v60  ;;  %v318_v63 = vsub.f32 0.0, %v300_v61 }
 0x184   : > { %551 = vpow2.f32 %v324_v59 }
 0x185   : > { %v330_v3 = vmul.f32 1.442695, %v319_v62  ;;  %v328_v7 = vmul.f32 1.442695, %v318_v63 }
 0x186   : > { %v309_v10 = vpop.xlane.xlu1 %308  ;;  %v306_v11 = vpop.xlane.xlu0 %305 }
 0x187   : > { %553 = vpow2.f32 %v330_v3  ;;  %v321_v16 = vsub.f32 0.0, %v309_v10  ;;  %v320_v17 = vsub.f32 0.0, %v306_v11 }
 0x188   : > { %555 = vpow2.f32 %v328_v7 }
 0x189   : > { %v334_v22 = vmul.f32 1.442695, %v321_v16  ;;  %v332_v23 = vmul.f32 1.442695, %v320_v17 }
 0x18a   : > { %v315_v24 = vpop.xlane.xlu1 %314  ;;  %v312_v25 = vpop.xlane.xlu0 %311 }
 0x18b   : > { %557 = vpow2.f32 %v334_v22  ;;  %v323_v26 = vsub.f32 0.0, %v315_v24  ;;  %v322_v27 = vsub.f32 0.0, %v312_v25 }
 0x18c   : > { %559 = vpow2.f32 %v332_v23 }
 0x18d   : > { %v550_v28 = vpop.eup %549  ;;  %v338_v29 = vmul.f32 1.442695, %v323_v26  ;;  %v336_v32 = vmul.f32 1.442695, %v322_v27 }
 0x18e   : > { %v552_v30 = vpop.eup %551  ;;  %v341_v31 = vadd.f32 1.0, %v550_v28 }
 0x18f   : > { %v340_v33 = vadd.f32 1.0, %v552_v30  ;;  %561 = vpow2.f32 %v338_v29 }
 0x190   : > { %563 = vrcp.f32 %v341_v31 }
 0x191   : > { %v554_v34 = vpop.eup %553  ;;  %565 = vrcp.f32 %v340_v33 }
 0x192   : > { %v556_v35 = vpop.eup %555  ;;  %v343_v36 = vadd.f32 1.0, %v554_v34  ;;  %567 = vpow2.f32 %v336_v32 }
 0x193   : > { %v342_v37 = vadd.f32 1.0, %v556_v35 }
 0x194   : > { %569 = vrcp.f32 %v343_v36 }
 0x195   : > { %v558_v38 = vpop.eup %557  ;;  %571 = vrcp.f32 %v342_v37 }
 0x196   : > { %v560_v39 = vpop.eup %559  ;;  %v345_v40 = vadd.f32 1.0, %v558_v38 }
 0x197   : > { %v344_v41 = vadd.f32 1.0, %v560_v39 }
 0x198   : > { %573 = vrcp.f32 %v345_v40 }
 0x199   : > { %v562_v42 = vpop.eup %561  ;;  %575 = vrcp.f32 %v344_v41 }
 0x19a   : > { %v564_v43 = vpop.eup %563  ;;  %v347_v44 = vadd.f32 1.0, %v562_v42 }
 0x19b   : > { %v566_v45 = vpop.eup %565  ;;  %v366_v46 = vmul.f32 %v564_v43, %v829_v5  ;;  %v367_v47 = vmul.f32 %v564_v43, %v831_v6 }
 0x19c   : > { %v568_v48 = vpop.eup %567  ;;  %v364_v49 = vmul.f32 %v566_v45, %v819_v0  ;;  %v365_v50 = vmul.f32 %v566_v45, %v821_v1  ;;  %577 = vrcp.f32 %v347_v44 }
 0x19d   : > { %382 = vst [vmem:[%s937_s23 + $0x10] sm:$0xff] %v366_v46  ;;  %383 = vst [vmem:[%s937_s23 + $0x18] sm:$0xff] %v367_v47  ;;  %v346_v5 = vadd.f32 1.0, %v568_v48 }
 0x19e   : > { %v570_v6 = vpop.eup %569  ;;  %380 = vst [vmem:[%s937_s23] sm:$0xff] %v364_v49  ;;  %381 = vst [vmem:[%s937_s23 + $0x8] sm:$0xff] %v365_v50 }
 0x19f   : > { %v572_v0 = vpop.eup %571  ;;  %v370_v1 = vmul.f32 %v570_v6, %v835_v8  ;;  %v371_v51 = vmul.f32 %v570_v6, %v837_v9  ;;  %579 = vrcp.f32 %v346_v5 }
 0x1a0   : > { %v368_v52 = vmul.f32 %v572_v0, %v823_v2  ;;  %v369_v53 = vmul.f32 %v572_v0, %v827_v4 }
 0x1a1   : > { %386 = vst [vmem:[%s937_s23 + $0x30] sm:$0xff] %v370_v1  ;;  %387 = vst [vmem:[%s937_s23 + $0x38] sm:$0xff] %v371_v51 }
 0x1a2   : > { %v574_v54 = vpop.eup %573  ;;  %384 = vst [vmem:[%s937_s23 + $0x20] sm:$0xff] %v368_v52  ;;  %385 = vst [vmem:[%s937_s23 + $0x28] sm:$0xff] %v369_v53 }
 0x1a3   : > { %v576_v55 = vpop.eup %575  ;;  %v374_v8 = vmul.f32 %v574_v54, %v847_v14  ;;  %v375_v9 = vmul.f32 %v574_v54, %v849_v15 }
 0x1a4   : > { %v372_v56 = vmul.f32 %v576_v55, %v843_v12  ;;  %v373_v2 = vmul.f32 %v576_v55, %v845_v13 }
 0x1a5   : > { %390 = vst [vmem:[%s937_s23 + $0x50] sm:$0xff] %v374_v8  ;;  %391 = vst [vmem:[%s937_s23 + $0x58] sm:$0xff] %v375_v9 }
 0x1a6   : > { %v578_v4 = vpop.eup %577  ;;  %388 = vst [vmem:[%s937_s23 + $0x40] sm:$0xff] %v372_v56  ;;  %389 = vst [vmem:[%s937_s23 + $0x48] sm:$0xff] %v373_v2 }
 0x1a7   : > { %v378_v57 = vmul.f32 %v578_v4, %v859_v20  ;;  %v379_v14 = vmul.f32 %v578_v4, %v861_v21 }
 0x1a9   : > { %v580_v15 = vpop.eup %579  ;;  %394 = vst [vmem:[%s937_s23 + $0x70] sm:$0xff] %v378_v57  ;;  %395 = vst [vmem:[%s937_s23 + $0x78] sm:$0xff] %v379_v14 }
 0x1aa   : > { %v376_v12 = vmul.f32 %v580_v15, %v855_v18  ;;  %v377_v13 = vmul.f32 %v580_v15, %v857_v19 }
 0x1ac   : > { %392 = vst [vmem:[%s937_s23 + $0x60] sm:$0xff] %v376_v12  ;;  %393 = vst [vmem:[%s937_s23 + $0x68] sm:$0xff] %v377_v13 }
 0x1ad   : > { %624 = shalt.err (!%p621_p2)
}
 0x1ae   : > { %s625_s26 = scalar_lea.hbm %s968_s8, 2048  ;;  %s629_s29 = scalar_lea.hbm %s1021_s3, 4096 }
 0x1af   : > { %p626_p4 = scmp.ne.s32.totalorder %s968_s8, %s625_s26  ;;  %p630_p9 = scmp.lt.u32.totalorder %s968_s8, %s1021_s3 }
 0x1b0   : > { %p631_p1 = scmp.lt.u32.totalorder %s629_s29, %s625_s26  ;;  %p633_p6 = scmp.lt.u32.totalorder %s625_s26, %s968_s8 }
 0x1b1   : > { %p627_p5 = pnand %p626_p4, %p1028_p11 }
 0x1b2   : > { %p632_p3 = por %p631_p1, %p630_p9 }
 0x1b3   : > { %p628_p7 = pneg %p627_p5 }
 0x1b4   : > { %p634_p12 = por %p633_p6, %p632_p3 }
 0x1b6   : > { %p635_p13 = pnand %p634_p12, %p628_p7 }
 0x1b8   : > { %638 = shalt.err (!%p635_p13)
}
 0x1b9   : > { %s683_s11 = smov 256   ;;  %s684_s23 = smov 16  }
 0x1ba   : > { %501 = dma.vmem_to_hbm [thread:$0]  (%p1028_p11), %s970_s4, 2048, %s968_s8, %s397_s16, %s683_s11, %s683_s11, %s684_s23  }
 0x1bb PF: > { %s425_s9 = sand.u32 1, %s665_s12   ;;  %p1029_p8 = scmp.ne.s32.totalorder %s1026_s25, 0 }
 0x1bc   : > { %p1030_p10 = scmp.ge.s32.totalorder %s677_s15, 2  ;;  %s426_s6 = scalar_lea.sflag [#allocation4], %s425_s9 }
 0x1be   : > { %p508_p0 = pnand %p1030_p10, %p1029_p8 }
 0x1c0   : > { %660 = dma.done.wait (!%p508_p0), %s426_s6, 2048  }
 0x1c1   : > { %662 = vsyncadd (!%p508_p0), %s426_s6, 4294965248  ;;  %p16_p2 = scmp.ge.s32.totalorder %s730_s18, 4   ;;  %s1031_s12 = smov %s669_s13 }
 0x1c2   : > { %s1032_s13 = smov %s673_s14  ;;  %s1033_s14 = smov %s742_s21 }
 0x1c3   : > { %s1034_s15 = smov %s730_s18  ;;  %18 = sbr.rel (!%p16_p2) target bundleno = 5 (0x5), region = 77 }
 0x1ca   :  { %431 = vsyncpa [#allocation3], 1 }
 0x1cb   :  { %433 = vsyncpa [#allocation3 + $0x1], 1 }
 0x1cc   :  { %434 = vsyncpa [#allocation4], 1 }
 0x1cd   :  { %436 = vsyncpa [#allocation4 + $0x1], 1 }

</bundles_post_ra>
